<compile_context>
chip_gen: v6e
topology: v6e:2x2x1
jax: 0.10.0
libtpu: 0.0.40
codegen_flags: <defaults>
</compile_context>

<pallas_src>
import functools

import jax
import jax.numpy as jnp
from jax.experimental import pallas as pl
from jax.experimental.pallas import tpu as pltpu


def _softplus(x):
    # Numerically stable softplus: log(exp(x)+1) == max(x,0) + log1p(exp(-|x|)).
    # Matches the PyTorch spec for non-overflowing inputs, stays finite for
    # large pre-activations.
    return jnp.maximum(x, 0.0) + jnp.log1p(jnp.exp(-jnp.abs(x)))


def mlp_kernel(x_ref, w1_ref, b1_ref, w2_ref, b2_ref, w3t_ref, b3_ref, o_ref):
    x = x_ref[...]                       # (D_in, T)   lane-dense batch tile
    w1 = w1_ref[...]                     # (H, D_in)

    # Layer 1: K = D_in (tiny, e.g. 2) -> rank-D_in broadcast MACs on the VPU;
    # bias folded into the accumulator init.
    d_in = x.shape[0]
    h1 = b1_ref[...] + w1[:, 0:1] * x[0:1, :]            # (H,T)
    for d in range(1, d_in):                             # static unrolled loop
        h1 = h1 + w1[:, d:d + 1] * x[d:d + 1, :]
    h1 = _softplus(h1)                                   # (H, T)

    # Layer 2: H x H matmul on the MXU; N = batch tile (lane-dense).
    # Precision pinned explicitly (exact f32) -- see header comment.
    h2 = jnp.dot(w2_ref[...], h1,
                 preferred_element_type=jnp.float32,
                 precision=jax.lax.Precision.HIGHEST)
    h2 = _softplus(h2 + b2_ref[...])                     # (H, T)

    # Layer 3: output_size == 1 -> elementwise multiply + sublane (XLU) reduce.
    o_ref[...] = jnp.sum(w3t_ref[...] * h2, axis=0, keepdims=True) + b3_ref[...]


def _choose_tiling(batch, max_tile):
    """Lane-aligned batch tile (<= max_tile) with >= 2 grid steps (v7x dual-TC)."""
    half = -(-batch // 2)                                # ceil(batch / 2)
    tile = min(max_tile, ((half + 127) // 128) * 128)    # lane-aligned
    grid = max(2, -(-batch // tile))                     # >= 2 steps
    return tile, grid, grid * tile                       # tile, grid, padded batch


@functools.partial(jax.jit, static_argnames=("batch_tile",))
def mlp_forward(x, params, *, batch_tile=8192):
    """3-layer MLP forward.  `params` in PyTorch nn.Linear layout:
    weights (out, in), biases (out,).  x is (batch, input_size)."""
    w1, b1, w2, b2, w3, b3 = params
    B, D_in = x.shape
    H = w1.shape[0]
    D_out = w3.shape[0]
    assert D_out == 1, "kernel's layer-3 reduce path targets output_size == 1"

    tile, grid, Bp = _choose_tiling(B, batch_tile)

    # Lane-dense layout: batch on the last (128-lane) axis.  Under jit the
    # cast + pad + transpose fuse into one copy (no standalone transpose pass).
    # TODO(synk): if the producer of x lives in the same jit, emit x directly
    # as (D_in, B) and skip this copy entirely.
    xt = jnp.zeros((D_in, Bp), jnp.float32).at[:, :B].set(
        jnp.asarray(x, jnp.float32).T)

    w1f = jnp.asarray(w1, jnp.float32)
    w2f = jnp.asarray(w2, jnp.float32)
    b1c = jnp.asarray(b1, jnp.float32).reshape(H, 1)
    b2c = jnp.asarray(b2, jnp.float32).reshape(H, 1)
    w3t = jnp.asarray(w3, jnp.float32).T                 # (H, D_out) == (H, 1)
    b3c = jnp.asarray(b3, jnp.float32).reshape(D_out, 1)

    out_t = pl.pallas_call(
        mlp_kernel,
        out_shape=jax.ShapeDtypeStruct((D_out, Bp), jnp.float32),
        grid=(grid,),
        in_specs=[
            pl.BlockSpec((D_in, tile), lambda i: (0, i)),   # x tile (lane-dense)
            pl.BlockSpec((H, D_in), lambda i: (0, 0)),      # w1 (resident)
            pl.BlockSpec((H, 1), lambda i: (0, 0)),         # b1
            pl.BlockSpec((H, H), lambda i: (0, 0)),         # w2
            pl.BlockSpec((H, 1), lambda i: (0, 0)),         # b2
            pl.BlockSpec((H, D_out), lambda i: (0, 0)),     # w3^T
            pl.BlockSpec((D_out, 1), lambda i: (0, 0)),     # b3
        ],
        out_specs=pl.BlockSpec((D_out, tile), lambda i: (0, i)),
        compiler_params=pltpu.CompilerParams(
            dimension_semantics=("parallel",)
        ),
    )(xt, w1f, b1c, w2f, b2c, w3t, b3c)

    # D_out == 1: transpose of (1, Bp) is a free reshape; drop padded rows.
    return out_t.reshape(Bp, D_out)[:B]


def init_params(key, input_size, hidden_size, output_size):
    """PyTorch-style uniform fan-in init, in nn.Linear (out, in) layout."""
    ks = jax.random.split(key, 6)

    def uniform(k, shape, fan_in):
        bound = 1.0 / jnp.sqrt(fan_in)
        return jax.random.uniform(k, shape, jnp.float32, -bound, bound)

    w1 = uniform(ks[0], (hidden_size, input_size), input_size)
    b1 = uniform(ks[1], (hidden_size,), input_size)
    w2 = uniform(ks[2], (hidden_size, hidden_size), hidden_size)
    b2 = uniform(ks[3], (hidden_size,), hidden_size)
    w3 = uniform(ks[4], (output_size, hidden_size), hidden_size)
    b3 = uniform(ks[5], (output_size,), hidden_size)
    return (w1, b1, w2, b2, w3, b3)


def reference_forward(x, params):
    # Spec semantics: softplus(x) = log(exp(x) + 1) around nn.Linear layers.
    w1, b1, w2, b2, w3, b3 = params
    h1 = jnp.log(jnp.exp(x @ w1.T + b1) + 1.0)
    h2 = jnp.log(jnp.exp(h1 @ w2.T + b2) + 1.0)
    return h2 @ w3.T + b3


if __name__ == "__main__":
    # NN_2dim: input_size=2 (2-D inputs), hidden_size=32, output_size=1
    input_size, hidden_size, output_size = 2, 32, 1

    key = jax.random.PRNGKey(0)
    kx, kp, kx2, kx3 = jax.random.split(key, 4)
    params = init_params(kp, input_size, hidden_size, output_size)

    # Small case: padded to 2 lane-aligned tiles (grid=(2,)).
    batch = 16
    x = jax.random.normal(kx, (batch, input_size), jnp.float32)
    out = jax.block_until_ready(mlp_forward(x, params))
    ref = reference_forward(x, params)
    assert out.shape == (batch, output_size)
    assert jnp.allclose(out, ref, atol=1e-5, rtol=1e-5), "mismatch vs JAX reference"

    # Unaligned batch: exercises the wrapper-side padding + slice path.
    batch2 = 300
    x2 = jax.random.normal(kx2, (batch2, input_size), jnp.float32)
    out2 = jax.block_until_ready(mlp_forward(x2, params))
    ref2 = reference_forward(x2, params)
    assert out2.shape == (batch2, output_size)
    assert jnp.allclose(out2, ref2, atol=1e-5, rtol=1e-5), "mismatch vs JAX reference"

    # Larger lane-aligned batch: exercises the multi-step tiled path.
    batch3 = 1024
    x3 = jax.random.normal(kx3, (batch3, input_size), jnp.float32)
    out3 = jax.block_until_ready(mlp_forward(x3, params, batch_tile=512))
    ref3 = reference_forward(x3, params)
    assert out3.shape == (batch3, output_size)
    assert jnp.allclose(out3, ref3, atol=1e-5, rtol=1e-5), "mismatch vs JAX reference"

    print("KERNEL_OK")
</pallas_src>

<mosaic_0001>
module attributes {stable_mosaic.version = 11 : i64} {
  func.func @mlp_kernel(%arg0: i32, %arg1: memref<2x128xf32, #tpu.memory_space<vmem>>, %arg2: memref<32x2xf32, #tpu.memory_space<vmem>>, %arg3: memref<32x1xf32, #tpu.memory_space<vmem>>, %arg4: memref<32x32xf32, #tpu.memory_space<vmem>>, %arg5: memref<32x1xf32, #tpu.memory_space<vmem>>, %arg6: memref<32x1xf32, #tpu.memory_space<vmem>>, %arg7: memref<1x1xf32, #tpu.memory_space<vmem>>, %arg8: memref<1x128xf32, #tpu.memory_space<vmem>>) attributes {dimension_semantics = [#tpu.dimension_semantics<parallel>], iteration_bounds = array<i64: 2>, scalar_prefetch = 0 : i64, scratch_operands = 0 : i64, tpu.core_type = #tpu.core_type<tc>, window_params = [{transform_indices = @transform_0, window_bounds = array<i64: 2, 128>}, {pipeline_mode = #tpu.pipeline_mode<synchronous>, transform_indices = @transform_1, window_bounds = array<i64: 32, 2>}, {pipeline_mode = #tpu.pipeline_mode<synchronous>, transform_indices = @transform_2, window_bounds = array<i64: 32, 1>}, {pipeline_mode = #tpu.pipeline_mode<synchronous>, transform_indices = @transform_3, window_bounds = array<i64: 32, 32>}, {pipeline_mode = #tpu.pipeline_mode<synchronous>, transform_indices = @transform_4, window_bounds = array<i64: 32, 1>}, {pipeline_mode = #tpu.pipeline_mode<synchronous>, transform_indices = @transform_5, window_bounds = array<i64: 32, 1>}, {pipeline_mode = #tpu.pipeline_mode<synchronous>, transform_indices = @transform_6, window_bounds = array<i64: 1, 1>}, {transform_indices = @transform_7, window_bounds = array<i64: 1, 128>}]} {
    %c0 = arith.constant 0 : index
    %c0_0 = arith.constant 0 : index
    %0 = vector.load %arg1[%c0, %c0_0] : memref<2x128xf32, #tpu.memory_space<vmem>>, vector<2x128xf32>
    %c0_1 = arith.constant 0 : index
    %c0_2 = arith.constant 0 : index
    %1 = vector.load %arg2[%c0_1, %c0_2] : memref<32x2xf32, #tpu.memory_space<vmem>>, vector<32x2xf32>
    %c0_3 = arith.constant 0 : index
    %c0_4 = arith.constant 0 : index
    %2 = vector.load %arg3[%c0_3, %c0_4] : memref<32x1xf32, #tpu.memory_space<vmem>>, vector<32x1xf32>
    %3 = vector.extract_strided_slice %1 {offsets = [0, 0], sizes = [32, 1], strides = [1, 1]} : vector<32x2xf32> to vector<32x1xf32>
    %4 = vector.extract_strided_slice %0 {offsets = [0, 0], sizes = [1, 128], strides = [1, 1]} : vector<2x128xf32> to vector<1x128xf32>
    %5 = vector.broadcast %3 : vector<32x1xf32> to vector<32x128xf32>
    %6 = vector.broadcast %4 : vector<1x128xf32> to vector<32x128xf32>
    %7 = arith.mulf %5, %6 : vector<32x128xf32>
    %8 = vector.broadcast %2 : vector<32x1xf32> to vector<32x128xf32>
    %9 = arith.addf %8, %7 : vector<32x128xf32>
    %10 = vector.extract_strided_slice %1 {offsets = [0, 1], sizes = [32, 1], strides = [1, 1]} : vector<32x2xf32> to vector<32x1xf32>
    %11 = vector.extract_strided_slice %0 {offsets = [1, 0], sizes = [1, 128], strides = [1, 1]} : vector<2x128xf32> to vector<1x128xf32>
    %12 = vector.broadcast %10 : vector<32x1xf32> to vector<32x128xf32>
    %13 = vector.broadcast %11 : vector<1x128xf32> to vector<32x128xf32>
    %14 = arith.mulf %12, %13 : vector<32x128xf32>
    %15 = arith.addf %9, %14 : vector<32x128xf32>
    %cst = arith.constant 0.000000e+00 : f32
    %16 = vector.broadcast %cst : f32 to vector<32x128xf32>
    %17 = arith.maximumf %15, %16 : vector<32x128xf32>
    %18 = math.absf %15 : vector<32x128xf32>
    %cst_5 = arith.constant 0.000000e+00 : f32
    %19 = vector.broadcast %cst_5 : f32 to vector<32x128xf32>
    %20 = arith.subf %19, %18 : vector<32x128xf32>
    %21 = math.exp %20 : vector<32x128xf32>
    %22 = math.log1p %21 : vector<32x128xf32>
    %23 = arith.addf %17, %22 : vector<32x128xf32>
    %c0_6 = arith.constant 0 : index
    %c0_7 = arith.constant 0 : index
    %24 = vector.load %arg4[%c0_6, %c0_7] : memref<32x32xf32, #tpu.memory_space<vmem>>, vector<32x32xf32>
    %cst_8 = arith.constant dense<0.000000e+00> : vector<32x128xf32>
    %25 = tpu.matmul %24, %23, %cst_8 {dimension_numbers = #tpu.dot_dimension_numbers<[1], [0], [0], [1], [0, 0, 1, 1], [], []>, precision = #tpu.contract_precision<fp32>} : vector<32x32xf32>, vector<32x128xf32>, vector<32x128xf32> -> vector<32x128xf32>
    %c0_9 = arith.constant 0 : index
    %c0_10 = arith.constant 0 : index
    %26 = vector.load %arg5[%c0_9, %c0_10] : memref<32x1xf32, #tpu.memory_space<vmem>>, vector<32x1xf32>
    %27 = vector.broadcast %26 : vector<32x1xf32> to vector<32x128xf32>
    %28 = arith.addf %25, %27 : vector<32x128xf32>
    %cst_11 = arith.constant 0.000000e+00 : f32
    %29 = vector.broadcast %cst_11 : f32 to vector<32x128xf32>
    %30 = arith.maximumf %28, %29 : vector<32x128xf32>
    %31 = math.absf %28 : vector<32x128xf32>
    %cst_12 = arith.constant 0.000000e+00 : f32
    %32 = vector.broadcast %cst_12 : f32 to vector<32x128xf32>
    %33 = arith.subf %32, %31 : vector<32x128xf32>
    %34 = math.exp %33 : vector<32x128xf32>
    %35 = math.log1p %34 : vector<32x128xf32>
    %36 = arith.addf %30, %35 : vector<32x128xf32>
    %c0_13 = arith.constant 0 : index
    %c0_14 = arith.constant 0 : index
    %37 = vector.load %arg6[%c0_13, %c0_14] : memref<32x1xf32, #tpu.memory_space<vmem>>, vector<32x1xf32>
    %38 = vector.broadcast %37 : vector<32x1xf32> to vector<32x128xf32>
    %39 = arith.mulf %38, %36 : vector<32x128xf32>
    %cst_15 = arith.constant dense<0.000000e+00> : vector<128xf32>
    %40 = vector.multi_reduction <add>, %39, %cst_15 [0] : vector<32x128xf32> to vector<128xf32>
    %41 = vector.shape_cast %40 : vector<128xf32> to vector<1x128xf32>
    %c0_16 = arith.constant 0 : index
    %c0_17 = arith.constant 0 : index
    %42 = vector.load %arg7[%c0_16, %c0_17] : memref<1x1xf32, #tpu.memory_space<vmem>>, vector<1x1xf32>
    %43 = vector.broadcast %42 : vector<1x1xf32> to vector<1x128xf32>
    %44 = arith.addf %41, %43 : vector<1x128xf32>
    %c0_18 = arith.constant 0 : index
    %c0_19 = arith.constant 0 : index
    %45 = vector.load %arg8[%c0_18, %c0_19] : memref<1x128xf32, #tpu.memory_space<vmem>>, vector<1x128xf32>
    tpu.vector_store %arg8[%c0_18, %c0_19], %44 {strides = array<i32>} : memref<1x128xf32, #tpu.memory_space<vmem>>, vector<1x128xf32>,
    return
  }
  func.func @transform_0(%arg0: i32) -> (i32, i32) {
    %c0_i32 = arith.constant 0 : i32
    %c0_i32_0 = arith.constant 0 : i32
    return %c0_i32, %arg0 : i32, i32
  }
  func.func @transform_1(%arg0: i32) -> (i32, i32) {
    %c0_i32 = arith.constant 0 : i32
    %c0_i32_0 = arith.constant 0 : i32
    %c0_i32_1 = arith.constant 0 : i32
    return %c0_i32, %c0_i32_0 : i32, i32
  }
  func.func @transform_2(%arg0: i32) -> (i32, i32) {
    %c0_i32 = arith.constant 0 : i32
    %c0_i32_0 = arith.constant 0 : i32
    %c0_i32_1 = arith.constant 0 : i32
    return %c0_i32, %c0_i32_0 : i32, i32
  }
  func.func @transform_3(%arg0: i32) -> (i32, i32) {
    %c0_i32 = arith.constant 0 : i32
    %c0_i32_0 = arith.constant 0 : i32
    %c0_i32_1 = arith.constant 0 : i32
    return %c0_i32, %c0_i32_0 : i32, i32
  }
  func.func @transform_4(%arg0: i32) -> (i32, i32) {
    %c0_i32 = arith.constant 0 : i32
    %c0_i32_0 = arith.constant 0 : i32
    %c0_i32_1 = arith.constant 0 : i32
    return %c0_i32, %c0_i32_0 : i32, i32
  }
  func.func @transform_5(%arg0: i32) -> (i32, i32) {
    %c0_i32 = arith.constant 0 : i32
    %c0_i32_0 = arith.constant 0 : i32
    %c0_i32_1 = arith.constant 0 : i32
    return %c0_i32, %c0_i32_0 : i32, i32
  }
  func.func @transform_6(%arg0: i32) -> (i32, i32) {
    %c0_i32 = arith.constant 0 : i32
    %c0_i32_0 = arith.constant 0 : i32
    %c0_i32_1 = arith.constant 0 : i32
    return %c0_i32, %c0_i32_0 : i32, i32
  }
  func.func @transform_7(%arg0: i32) -> (i32, i32) {
    %c0_i32 = arith.constant 0 : i32
    %c0_i32_0 = arith.constant 0 : i32
    return %c0_i32, %arg0 : i32, i32
  }
}

</mosaic_0001>

<bundles_post_ra>
// kernel: mlp_forward.1
= control target key start
LH: loop header
LB: loop body
LE: loop exit
PB: predicated region body
PF: predicated region fallthrough
CT: control target
= control target key end

     0   :  { %s1475_s26 = smov 0   ;;  %s1715_s0 = inlined_call_operand.vmem [shape: f32[2,256], index: 0, kind: input, shape index: {}]   ;;  %s1716_s1 = inlined_call_operand.vmem [shape: f32[32,2], index: 1, kind: input, shape index: {}]   ;;  %s1717_s2 = inlined_call_operand.vmem [shape: f32[32,1], index: 2, kind: input, shape index: {}]   ;;  %s1718_s3 = inlined_call_operand.vmem [shape: f32[32,32], index: 3, kind: input, shape index: {}]   ;;  %s1719_s4 = inlined_call_operand.vmem [shape: f32[32,1], index: 4, kind: input, shape index: {}]   ;;  %s1720_s5 = inlined_call_operand.vmem [shape: f32[32,1], index: 5, kind: input, shape index: {}]   ;;  %s1721_s6 = inlined_call_operand.<no memory space> [shape: f32[1,1], index: 6, kind: input, shape index: {}]   ;;  %s1722_s7 = inlined_call_operand.vmem [shape: f32[1,256], index: 7, kind: output, shape index: {}]  }
   0x1   :  { %v12_v0 = vstv %s1721_s6 }
   0x2   :  { %13 = vst [vmem:[#allocation2] sm:$0x1] %v12_v0 }
   0x3 LB: > { %s1234_s27 = sadd.s32 4294967295, %s1428_s26   ;;  %p1238_p0 = scmp.ge.s32.totalorder %s1428_s26, 1  ;;  %s1428_s26 = sphi %s1475_s26, %s19_s26  }
   0x4   : > { %p238_p1 = scmp.lt.s32.totalorder %s1428_s26, 3 }
   0x6   : > { %p239_p2 = pnand %p1238_p0, %p238_p1 }
   0x7   : > { %p267_p3 = scmp.lt.s32.totalorder (!%p239_p2), %s1234_s27, 1 }
   0x8   : > { %242 = sbr.rel (%p239_p2) target bundleno = 501 (0x1f5), region = 48 }
   0xd   : > { %v282_v1 = vld [vmem:[%s1717_s2 + $0x18] sm:$0xff]  ;;  %v1430_v3 = vmov 0   ;;  %v277_v4 = vld [vmem:[%s1716_s1 + $0x10] sm:$0xff]  ;;  %v1431_v5 = vmov 1   ;;  %v276_v6 = vld [vmem:[%s1716_s1 + $0x8] sm:$0xff]  ;;  %vm451_vm0 = vcmask 261120   ;;  %v303_v26 = vlaneseq }
   0xe   : > { %v278_v2 = vld [vmem:[%s1716_s1 + $0x18] sm:$0xff]  ;;  %1385 = vset.pattern.permute.xlu1 %v1430_v3  ;;  %1384 = vset.pattern.permute.xlu0 %v1430_v3  ;;  %v281_v7 = vld [vmem:[%s1717_s2 + $0x10] sm:$0xff]  ;;  %v275_v8 = vld [vmem:[%s1716_s1] sm:$0xff]  ;;  %s1726_s27 = smov (!%p267_p3, %s1234_s27), 1 }
   0xf   : > { %328 = vperm.xlu1 %1385, %v282_v1   ;;  %300 = vperm.xlu0 %1384, %v278_v2   ;;  %v280_v9 = vld [vmem:[%s1717_s2 + $0x8] sm:$0xff]  ;;  %v279_v10 = vld [vmem:[%s1717_s2] sm:$0xff]  ;;  %v429_v12 = vld [vmem:[%s1719_s4 + $0x10] sm:$0xff]  ;;  %s1239_s16 = sshll.u32 %s1726_s27, 1  ;;  %v1552_v28 = vshrl.u32 %v303_v26, 7  ;;  %s273_s6 = scalar_lea.vmem %s1722_s7, %s1726_s27 }
  0x10   : > { %v427_v11 = vld [vmem:[%s1719_s4] sm:$0xff]  ;;  %v430_v13 = vld [vmem:[%s1719_s4 + $0x18] sm:$0xff]  ;;  %v1139_v14 = vld [vmem:[%s1720_s5 + $0x8] sm:$0xff]  ;;  %s270_s19 = scalar_lea.vmem %s1715_s0, %s1239_s16 }
  0x11   : > { %v1141_v15 = vld [vmem:[%s1720_s5 + $0x18] sm:$0xff]  ;;  %v423_v16 = vld [vmem:[%s1718_s3] sm:$0xff]  ;;  %v428_v23 = vld [vmem:[%s1719_s4 + $0x8] sm:$0xff]  ;;  %v305_v29 = vsub.s32 0, %v1552_v28  ;;  %v353_v32 = vsub.s32 1, %v1552_v28 }
  0x12   : > { %v453_v17 = vsel %vm451_vm0, %v423_v16, 0  ;;  %v1138_v24 = vld [vmem:[%s1720_s5] sm:$0xff]  ;;  %v1140_v25 = vld [vmem:[%s1720_s5 + $0x10] sm:$0xff] }
  0x13   : > { %1386 = vset.pattern.permute.xlu1 %v1431_v5  ;;  %295 = vperm.xlu0 %1384, %v277_v4   ;;  %v1526_v18 = vand.u32 4294901760, %v453_v17  ;;  %v1175_v27 = vld [vmem:[#allocation2] sm:$0x1] }
  0x14   : > { %348 = vperm.xlu1 %1386, %v278_v2   ;;  %v274_v30 = vld [vmem:[%s270_s19] sm:$0x3] }
  0x15   : > { %v1529_v19 = vsub.f32 %v453_v17, %v1526_v18  ;;  %1312 = vmatprep.mubr.f32.mxu1 %v1526_v18  ;;  %v306_v31 = vrot.slane %v274_v30, %v305_v29  ;;  %v354_v36 = vrot.slane %v274_v30, %v353_v32 }
  0x17   : > { %290 = vperm.xlu0 %1384, %v276_v6   ;;  %v535_v20 = vand.u32 4294901760, %v1529_v19 }
  0x18   : > { %1387 = vset.pattern.permute.xlu1 %v1430_v3 }
  0x19   : > { %323 = vperm.xlu1 %1387, %v281_v7   ;;  %v536_v21 = vsub.f32 %v1529_v19, %v535_v20 }
  0x1b   : > { %1388 = vset.pattern.permute.xlu0 %v1431_v5  ;;  %v537_v22 = vand.u32 4294901760, %v536_v21 }
  0x1c   : > { %344 = vperm.xlu0 %1388, %v277_v4  }
  0x1d   : > { %285 = vperm.xlu1 %1387, %v275_v8   ;;  %1298 = vmatprep.mubr.f32.mxu0 %v537_v22  ;;  %v424_v22 = vld [vmem:[%s1718_s3 + $0x8] sm:$0xff] }
  0x1e   : > { %v456_v32 = vsel %vm451_vm0, %v424_v22, 0 }
  0x20   : > { %340 = vperm.xlu0 %1388, %v276_v6  }
  0x21   : > { %318 = vperm.xlu1 %1387, %v280_v9  }
  0x24   : > { %336 = vperm.xlu0 %1388, %v275_v8  }
  0x25   : > { %313 = vperm.xlu1 %1387, %v279_v10  }
  0x28   : > { %1389 = vset.pattern.permute.xlu0 %v1430_v3 }
  0x29   : > { %433 = vperm.xlu1 %1387, %v427_v11   ;;  %438 = vperm.xlu0 %1389, %v428_v23  }
  0x2d   : > { %443 = vperm.xlu1 %1387, %v429_v12   ;;  %1144 = vperm.xlu0 %1389, %v1138_v24  }
  0x31   : > { %448 = vperm.xlu1 %1387, %v430_v13   ;;  %1154 = vperm.xlu0 %1389, %v1140_v25  }
  0x35   : > { %1149 = vperm.xlu1 %1387, %v1139_v14   ;;  %1178 = vperm.xlu0 %1389, %v1175_v27  }
  0x39   : > { %1159 = vperm.xlu1 %1387, %v1141_v15  }
  0x8a   : > { %v329_v33 = vpop.permute.xlu1 %328  ;;  %v301_v34 = vpop.permute.xlu0 %300 }
  0x8b   : > { %v310_v35 = vmul.f32 %v306_v31, %v301_v34 }
  0x8d   : > { %v334_v39 = vadd.f32 %v329_v33, %v310_v35  ;;  %v425_v33 = vld [vmem:[%s1718_s3 + $0x10] sm:$0xff] }
  0x8e   : > { %v296_v37 = vpop.permute.xlu0 %295 }
  0x8f   : > { %v349_v38 = vpop.permute.xlu1 %348  ;;  %v309_v45 = vmul.f32 %v306_v31, %v296_v37 }
  0x90   : > { %v358_v40 = vmul.f32 %v354_v36, %v349_v38  ;;  %v1580_v38 = vand.u32 4294901760, %v456_v32 }
  0x92   : > { %v362_v41 = vadd.f32 %v358_v40, %v334_v39  ;;  %v291_v42 = vpop.permute.xlu0 %290  ;;  %v459_v39 = vsel %vm451_vm0, %v425_v33, 0  ;;  %v426_v40 = vld [vmem:[%s1718_s3 + $0x18] sm:$0xff] }
  0x93   : > { %v308_v53 = vmul.f32 %v306_v31, %v291_v42 }
  0x94   : > { %v370_v43 = vand.u32 2147483647, %v362_v41  ;;  %v324_v44 = vpop.permute.xlu1 %323  ;;  %v366_v30 = vmax.f32 %v362_v41, 0.0 }
  0x95   : > { %v333_v49 = vadd.f32 %v324_v44, %v309_v45  ;;  %v1592_v45 = vand.u32 4294901760, %v459_v39 }
  0x96   : > { %v374_v46 = vsub.f32 0.0, %v370_v43 }
  0x97   : > { %v345_v47 = vpop.permute.xlu0 %344 }
  0x98   : > { %v381_v48 = vmul.f32 1.442695, %v374_v46  ;;  %v357_v50 = vmul.f32 %v354_v36, %v345_v47  ;;  %v286_v51 = vpop.permute.xlu1 %285  ;;  %v462_v46 = vsel %vm451_vm0, %v426_v40, 0 }
  0x99   : > { %v307_v60 = vmul.f32 %v306_v31, %v286_v51 }
  0x9a   : > { %1390 = vpow2.f32 %v381_v48  ;;  %v1561_v52 = vadd.f32 %v357_v50, %v333_v49  ;;  %v1597_v50 = vsub.f32 %v456_v32, %v1580_v38 }
  0x9b   : > { %v341_v54 = vpop.permute.xlu0 %340 }
  0x9c   : > { %v369_v55 = vand.u32 2147483647, %v1561_v52  ;;  %v356_v56 = vmul.f32 %v354_v36, %v341_v54  ;;  %v319_v57 = vpop.permute.xlu1 %318  ;;  %v365_v51 = vmax.f32 %v1561_v52, 0.0  ;;  %v545_v52 = vand.u32 4294901760, %v1597_v50 }
  0x9d   : > { %v332_v58 = vadd.f32 %v319_v57, %v308_v53  ;;  %v1604_v57 = vand.u32 4294901760, %v462_v46 }
  0x9e   : > { %v373_v59 = vsub.f32 0.0, %v369_v55 }
  0x9f   : > { %v1564_v61 = vadd.f32 %v356_v56, %v332_v58  ;;  %v337_v62 = vpop.permute.xlu0 %336 }
  0xa0   : > { %v379_v63 = vmul.f32 1.442695, %v373_v59  ;;  %v355_v0 = vmul.f32 %v354_v36, %v337_v62  ;;  %v314_v1 = vpop.permute.xlu1 %313 }
  0xa1   : > { %v368_v2 = vand.u32 2147483647, %v1564_v61  ;;  %v331_v3 = vadd.f32 %v314_v1, %v307_v60  ;;  %v1609_v60 = vsub.f32 %v459_v39, %v1592_v45 }
  0xa2   : > { %1392 = vpow2.f32 %v379_v63 }
  0xa3   : > { %v372_v4 = vsub.f32 0.0, %v368_v2  ;;  %v1567_v5 = vadd.f32 %v355_v0, %v331_v3 }
  0xa5   : > { %v377_v6 = vmul.f32 1.442695, %v372_v4  ;;  %v367_v7 = vand.u32 2147483647, %v1567_v5  ;;  %v364_v4 = vmax.f32 %v1564_v61, 0.0 }
  0xa7   : > { %v1391_v8 = vpop.eup %1390  ;;  %1394 = vpow2.f32 %v377_v6  ;;  %v371_v9 = vsub.f32 0.0, %v367_v7  ;;  %v1617_v7 = vsub.f32 %v462_v46, %v1604_v57 }
  0xa8   : > { %v410_v10 = vadd.f32 1.0, %v1391_v8  ;;  %v413_v13 = vmul.f32 -0.5, %v1391_v8  ;;  %v416_v17 = vand.u32 2147483647, %v1391_v8 }
  0xa9   : > { %v375_v11 = vmul.f32 1.442695, %v371_v9 }
  0xaa   : > { %1396 = vlog2.f32 %v410_v10  ;;  %v414_v16 = vadd.f32 1.0, %v413_v13  ;;  %vm417_vm1 = vcmp.lt.f32.partialorder %v416_v17, 0.0004427343  ;;  %v555_v10 = vand.u32 4294901760, %v1609_v60 }
  0xab   : > { %1398 = vpow2.f32 %v375_v11  ;;  %v363_v17 = vmax.f32 %v1567_v5, 0.0 }
  0xac   : > { %v415_v26 = vmul.f32 %v1391_v8, %v414_v16 }
  0xaf   : > { %v1393_v12 = vpop.eup %1392 }
  0xb0   : > { %v401_v14 = vadd.f32 1.0, %v1393_v12  ;;  %v404_v27 = vmul.f32 -0.5, %v1393_v12  ;;  %v407_v42 = vand.u32 2147483647, %v1393_v12 }
  0xb2   : > { %1400 = vlog2.f32 %v401_v14  ;;  %v405_v36 = vadd.f32 1.0, %v404_v27  ;;  %vm408_vm2 = vcmp.lt.f32.partialorder %v407_v42, 0.0004427343 }
  0xb4   : > { %v1395_v15 = vpop.eup %1394  ;;  %v406_v48 = vmul.f32 %v1393_v12, %v405_v36 }
  0xb5   : > { %v392_v21 = vadd.f32 1.0, %v1395_v15  ;;  %v395_v37 = vmul.f32 -0.5, %v1395_v15  ;;  %v398_v56 = vand.u32 2147483647, %v1395_v15 }
  0xb7   : > { %v1397_v23 = vpop.eup %1396  ;;  %1402 = vlog2.f32 %v392_v21  ;;  %v396_v49 = vadd.f32 1.0, %v395_v37  ;;  %vm399_vm3 = vcmp.lt.f32.partialorder %v398_v56, 0.0004427343  ;;  %v565_v21 = vand.u32 4294901760, %v1617_v7 }
  0xb8   : > { %v1573_v24 = vpop.eup %1398  ;;  %v412_v25 = vmul.f32 0.6931472, %v1397_v23 }
  0xb9   : > { %v383_v31 = vadd.f32 1.0, %v1573_v24  ;;  %v386_v53 = vmul.f32 -0.5, %v1573_v24  ;;  %v397_v63 = vmul.f32 %v1395_v15, %v396_v49  ;;  %v389_v6 = vand.u32 2147483647, %v1573_v24 }
  0xba   : > { %v418_v34 = vsel %vm417_vm1, %v415_v26, %v412_v25  ;;  %v546_v15 = vsub.f32 %v1597_v50, %v545_v52  ;;  %v556_v25 = vsub.f32 %v1609_v60, %v555_v10  ;;  %v566_v32 = vsub.f32 %v1617_v7, %v565_v21 }
  0xbb   : > { %v422_v35 = vadd.f32 %v418_v34, %v366_v30  ;;  %1404 = vlog2.f32 %v383_v31  ;;  %v387_v2 = vadd.f32 1.0, %v386_v53  ;;  %vm390_vm4 = vcmp.lt.f32.partialorder %v389_v6, 0.0004427343 }
  0xbc   : > { %v547_v5 = vand.u32 4294901760, %v546_v15  ;;  %v557_v33 = vand.u32 4294901760, %v556_v25  ;;  %v567_v37 = vand.u32 4294901760, %v566_v32 }
  0xbd   : > { %v1586_v41 = vand.u32 4294901760, %v422_v35  ;;  %v388_v13 = vmul.f32 %v1573_v24, %v387_v2 }
  0xbf   : > { %v1401_v43 = vpop.eup %1400  ;;  %v1589_v44 = vsub.f32 %v422_v35, %v1586_v41  ;;  %1290 = vmatprep.subr.mxu0 %v1586_v41 }
  0xc0   : > { %v403_v47 = vmul.f32 0.6931472, %v1401_v43  ;;  %1291 = vmatpush3.msra.mxu0 %v1586_v41  ;;  %v434_v43 = vpop.permute.xlu1 %433 }
  0xc1   : > { %v1602_v54 = vand.u32 4294901760, %v1589_v44 }
  0xc2   : > { %v409_v55 = vsel %vm408_vm2, %v406_v48, %v403_v47  ;;  %v439_v48 = vpop.permute.xlu0 %438 }
  0xc3   : > { %v421_v58 = vadd.f32 %v409_v55, %v365_v51  ;;  %v601_v59 = vsub.f32 %v1589_v44, %v1602_v54 }
  0xc4   : > { %v1403_v62 = vpop.eup %1402 }
  0xc5   : > { %v1612_v0 = vand.u32 4294901760, %v421_v58  ;;  %v394_v1 = vmul.f32 0.6931472, %v1403_v62  ;;  %v602_v3 = vand.u32 4294901760, %v601_v59 }
  0xc7   : > { %v606_v8 = vsub.f32 %v421_v58, %v1612_v0  ;;  %v400_v9 = vsel %vm399_vm3, %v397_v63, %v394_v1  ;;  %1292 = vmatprep.subr.mxu0 %v1612_v0  ;;  %1304 = vmatprep.subr.mxu1 %v602_v3 }
  0xc8   : > { %v1405_v11 = vpop.eup %1404  ;;  %v420_v12 = vadd.f32 %v400_v9, %v364_v4  ;;  %1293 = vmatpush3.msra.mxu0 %v1612_v0  ;;  %1305 = vmatpush3.msra.mxu1 %v602_v3 }
  0xc9   : > { %v385_v61 = vmul.f32 0.6931472, %v1405_v11  ;;  %v607_v14 = vand.u32 4294901760, %v606_v8 }
  0xca   : > { %v1627_v16 = vand.u32 4294901760, %v420_v12 }
  0xcb   : > { %v391_v22 = vsel %vm390_vm4, %v388_v13, %v385_v61  ;;  %v608_v23 = vsub.f32 %v606_v8, %v607_v14 }
  0xcc   : > { %v613_v24 = vsub.f32 %v420_v12, %v1627_v16  ;;  %v419_v26 = vadd.f32 %v391_v22, %v363_v17  ;;  %1294 = vmatprep.subr.mxu0 %v1627_v16 }
  0xcd   : > { %1295 = vmatpush3.msra.mxu0 %v1627_v16  ;;  %v609_v27 = vand.u32 4294901760, %v608_v23 }
  0xce   : > { %v1637_v30 = vand.u32 4294901760, %v419_v26  ;;  %v614_v31 = vand.u32 4294901760, %v613_v24 }
  0xcf   : > { %1306 = vmatprep.subr.mxu1 %v609_v27 }
  0xd0   : > { %v620_v34 = vsub.f32 %v419_v26, %v1637_v30  ;;  %1296 = vmatprep.subr.mxu0 %v1637_v30  ;;  %1307 = vmatpush3.msra.mxu1 %v609_v27  ;;  %v615_v35 = vsub.f32 %v613_v24, %v614_v31 }
  0xd1   : > { %1297 = vmatpush3.msra.mxu0 %v1637_v30 }
  0xd2   : > { %1299 = vmatmul.mubr.f32.vlgmr.msra.gmra.mxu0 %v547_v5  ;;  %1318 = vmatprep.subr.mxu0 %v1589_v44  ;;  %v616_v36 = vand.u32 4294901760, %v615_v35  ;;  %v621_v39 = vand.u32 4294901760, %v620_v34 }
  0xd3   : > { %1319 = vmatpush3.msra.mxu0 %v1589_v44  ;;  %1301 = vmatprep.mubr.f32.mxu0 %v557_v33 }
  0xd4   : > { %1308 = vmatprep.subr.mxu1 %v616_v36  ;;  %1320 = vmatprep.subr.mxu0 %v606_v8  ;;  %v622_v40 = vsub.f32 %v620_v34, %v621_v39 }
  0xd5   : > { %1309 = vmatpush3.msra.mxu1 %v616_v36  ;;  %1321 = vmatpush3.msra.mxu0 %v606_v8 }
  0xd6   : > { %1302 = vmatmul.mubr.f32.gmra.mxu0 %v567_v37  ;;  %1322 = vmatprep.subr.mxu0 %v613_v24  ;;  %v623_v42 = vand.u32 4294901760, %v622_v40 }
  0xd7   : > { %1323 = vmatpush3.msra.mxu0 %v613_v24  ;;  %1326 = vmatprep.mubr.f32.mxu0 %v1529_v19 }
  0xd8   : > { %1310 = vmatprep.subr.mxu1 %v623_v42  ;;  %1324 = vmatprep.subr.mxu0 %v620_v34 }
  0xd9   : > { %1311 = vmatpush3.msra.mxu1 %v623_v42  ;;  %1325 = vmatpush3.msra.mxu0 %v620_v34 }
  0xda   : > { %1313 = vmatmul.mubr.f32.vlgmr.msra.gmra.mxu1 %v1580_v38  ;;  %1332 = vmatprep.subr.mxu1 %v1586_v41 }
  0xdb   : > { %1346 = vmatprep.subr.mxu0 %v1602_v54  ;;  %1327 = vmatmul.mubr.f32.vlgmr.msra.gmra.mxu0 %v1597_v50  ;;  %v444_v50 = vpop.permute.xlu1 %443 }
  0xdc   : > { %1333 = vmatpush3.msra.mxu1 %v1586_v41  ;;  %1347 = vmatpush3.msra.mxu0 %v1602_v54 }
  0xdd   : > { %1334 = vmatprep.subr.mxu1 %v1612_v0  ;;  %1348 = vmatprep.subr.mxu0 %v607_v14 }
  0xde   : > { %1315 = vmatprep.mubr.f32.mxu1 %v1592_v45  ;;  %1335 = vmatpush3.msra.mxu1 %v1612_v0 }
  0xdf   : > { %1349 = vmatpush3.msra.mxu0 %v607_v14  ;;  %1316 = vmatmul.mubr.f32.gmra.mxu1 %v1604_v57 }
  0xe0   : > { %1336 = vmatprep.subr.mxu1 %v1627_v16  ;;  %1350 = vmatprep.subr.mxu0 %v614_v31 }
  0xe1   : > { %1329 = vmatprep.mubr.f32.mxu0 %v1609_v60  ;;  %1337 = vmatpush3.msra.mxu1 %v1627_v16 }
  0xe2   : > { %1351 = vmatpush3.msra.mxu0 %v614_v31  ;;  %1338 = vmatprep.subr.mxu1 %v1637_v30 }
  0xe3   : > { %1330 = vmatmul.mubr.f32.gmra.mxu0 %v1617_v7  ;;  %1352 = vmatprep.subr.mxu0 %v621_v39 }
  0xe4   : > { %1339 = vmatpush3.msra.mxu1 %v1637_v30  ;;  %1340 = vmatprep.mubr.f32.mxu1 %v535_v20 }
  0xe5   : > { %1353 = vmatpush3.msra.mxu0 %v621_v39  ;;  %1341 = vmatmul.mubr.f32.vlgmr.msra.gmra.mxu1 %v545_v52 }
  0xe6   : > { %1360 = vmatprep.subr.mxu1 %v1586_v41  ;;  %1354 = vmatprep.mubr.f32.mxu0 %v1526_v18 }
  0xe7   : > { %1361 = vmatpush3.msra.mxu1 %v1586_v41  ;;  %1355 = vmatmul.mubr.f32.vlgmr.msra.gmra.mxu0 %v1580_v38 }
  0xe8   : > { %1362 = vmatprep.subr.mxu1 %v1612_v0  ;;  %1343 = vmatprep.mubr.f32.mxu1 %v555_v10 }
  0xe9   : > { %1363 = vmatpush3.msra.mxu1 %v1612_v0  ;;  %1357 = vmatprep.mubr.f32.mxu0 %v1592_v45 }
  0xea   : > { %1344 = vmatmul.mubr.f32.gmra.mxu1 %v565_v21  ;;  %1364 = vmatprep.subr.mxu1 %v1627_v16 }
  0xeb   : > { %1365 = vmatpush3.msra.mxu1 %v1627_v16  ;;  %1358 = vmatmul.mubr.f32.gmra.mxu0 %v1604_v57 }
  0xec   : > { %1366 = vmatprep.subr.mxu1 %v1637_v30  ;;  %1368 = vmatprep.mubr.f32.mxu1 %v1526_v18 }
  0xed   : > { %1367 = vmatpush3.msra.mxu1 %v1637_v30 }
  0xee   : > { %1369 = vmatmul.mubr.f32.vlgmr.msra.gmra.mxu1 %v1580_v38 }
  0xef   : > { %1371 = vmatprep.mubr.f32.mxu1 %v1592_v45  ;;  %v449_v45 = vpop.permute.xlu1 %448 }
  0xf2   : > { %1372 = vmatmul.mubr.f32.gmra.mxu1 %v1604_v57 }
 0x192   : > { %v1300_v19 = vpop.f32.mrf.mxu0 }
 0x193   : > { %v550_v51 = vadd.f32 %v1300_v19, %v439_v48 }
 0x194   : > { %v539_v20 = vpop.f32.mrf.mxu0 }
 0x195   : > { %v540_v55 = vadd.f32 %v539_v20, %v434_v43 }
 0x196   : > { %v1303_v41 = vpop.f32.mrf.mxu0 }
 0x197   : > { %v570_v58 = vadd.f32 %v1303_v41, %v449_v45 }
 0x198   : > { %v559_v44 = vpop.f32.mrf.mxu0 }
 0x199   : > { %v560_v1 = vadd.f32 %v559_v44, %v444_v50 }
 0x19a   : > { %v1314_v46 = vpop.f32.mrf.mxu1 }
 0x19b   : > { %v1328_v47 = vpop.f32.mrf.mxu0  ;;  %v667_v38 = vadd.f32 %v1314_v46, %v550_v51 }
 0x19c   : > { %v660_v49 = vpop.f32.mrf.mxu1 }
 0x19d   : > { %v758_v53 = vpop.f32.mrf.mxu0  ;;  %v661_v57 = vadd.f32 %v660_v49, %v540_v55  ;;  %v766_v62 = vadd.f32 %v1328_v47, %v667_v38 }
 0x19f   : > { %v1317_v18 = vpop.f32.mrf.mxu1  ;;  %v759_v2 = vadd.f32 %v758_v53, %v661_v57 }
 0x1a0   : > { %v679_v63 = vadd.f32 %v1317_v18, %v570_v58 }
 0x1a1   : > { %v672_v54 = vpop.f32.mrf.mxu1 }
 0x1a2   : > { %v673_v6 = vadd.f32 %v672_v54, %v560_v1 }
 0x1a3   : > { %v1331_v56 = vpop.f32.mrf.mxu0 }
 0x1a4   : > { %v780_v8 = vadd.f32 %v1331_v56, %v679_v63 }
 0x1a5   : > { %v772_v59 = vpop.f32.mrf.mxu0  ;;  %v1342_v60 = vpop.f32.mrf.mxu1 }
 0x1a6   : > { %v865_v3 = vadd.f32 %v1342_v60, %v766_v62  ;;  %v773_v13 = vadd.f32 %v772_v59, %v673_v6 }
 0x1a7   : > { %v856_v52 = vpop.f32.mrf.mxu1  ;;  %v1356_v0 = vpop.f32.mrf.mxu0 }
 0x1a8   : > { %v857_v9 = vadd.f32 %v856_v52, %v759_v2  ;;  %v970_v11 = vadd.f32 %v1356_v0, %v865_v3 }
 0x1a9   : > { %v963_v4 = vpop.f32.mrf.mxu0 }
 0x1aa   : > { %v1345_v7 = vpop.f32.mrf.mxu1  ;;  %v964_v15 = vadd.f32 %v963_v4, %v857_v9 }
 0x1ab   : > { %v881_v12 = vadd.f32 %v1345_v7, %v780_v8  ;;  %v1359_v61 = vpop.f32.mrf.mxu0 }
 0x1ac   : > { %v872_v10 = vpop.f32.mrf.mxu1 }
 0x1ad   : > { %v873_v17 = vadd.f32 %v872_v10, %v773_v13  ;;  %v982_v22 = vadd.f32 %v1359_v61, %v881_v12  ;;  %v975_v23 = vpop.f32.mrf.mxu0 }
 0x1ae   : > { %v1370_v14 = vpop.f32.mrf.mxu1 }
 0x1af   : > { %v1688_v16 = vadd.f32 %v1370_v14, %v970_v11  ;;  %v976_v31 = vadd.f32 %v975_v23, %v873_v17  ;;  %v1145_v11 = vpop.permute.xlu0 %1144 }
 0x1b0   : > { %v1056_v21 = vpop.f32.mrf.mxu1 }
 0x1b1   : > { %v1083_v25 = vand.u32 2147483647, %v1688_v16  ;;  %v1057_v24 = vadd.f32 %v1056_v21, %v964_v15  ;;  %v1079_v7 = vmax.f32 %v1688_v16, 0.0  ;;  %v1150_v15 = vpop.permute.xlu1 %1149 }
 0x1b2   : > { %v1373_v26 = vpop.f32.mrf.mxu1 }
 0x1b3   : > { %v1087_v27 = vsub.f32 0.0, %v1083_v25  ;;  %v1082_v30 = vand.u32 2147483647, %v1057_v24  ;;  %v1691_v5 = vadd.f32 %v1373_v26, %v982_v22  ;;  %v1078_v4 = vmax.f32 %v1057_v24, 0.0 }
 0x1b4   : > { %v1068_v32 = vpop.f32.mrf.mxu1 }
 0x1b5   : > { %v1092_v33 = vmul.f32 1.442695, %v1087_v27  ;;  %v1086_v34 = vsub.f32 0.0, %v1082_v30  ;;  %v1085_v35 = vand.u32 2147483647, %v1691_v5  ;;  %v1694_v36 = vadd.f32 %v1068_v32, %v976_v31  ;;  %v1155_v31 = vpop.permute.xlu0 %1154 }
 0x1b6   : > { %v1081_v25 = vmax.f32 %v1691_v5, 0.0 }
 0x1b7   : > { %1406 = vpow2.f32 %v1092_v33  ;;  %v1090_v37 = vmul.f32 1.442695, %v1086_v34  ;;  %v1089_v39 = vsub.f32 0.0, %v1085_v35  ;;  %v1084_v40 = vand.u32 2147483647, %v1694_v36  ;;  %v1160_v34 = vpop.permute.xlu1 %1159 }
 0x1b8   : > { %v1080_v24 = vmax.f32 %v1694_v36, 0.0 }
 0x1b9   : > { %1408 = vpow2.f32 %v1090_v37  ;;  %v1096_v42 = vmul.f32 1.442695, %v1089_v39  ;;  %v1088_v19 = vsub.f32 0.0, %v1084_v40  ;;  %v1179_v5 = vpop.permute.xlu0 %1178 }
 0x1ba   : > { %v1184_v36 = vrot.slane %v1179_v5, %v305_v29 }
 0x1bb   : > { %1410 = vpow2.f32 %v1096_v42  ;;  %v1094_v20 = vmul.f32 1.442695, %v1088_v19 }
 0x1bd   : > { %1412 = vpow2.f32 %v1094_v20 }
 0x1c4   : > { %v1407_v41 = vpop.eup %1406 }
 0x1c5   : > { %v1107_v43 = vadd.f32 1.0, %v1407_v41  ;;  %v1110_v51 = vmul.f32 -0.5, %v1407_v41  ;;  %v1113_v55 = vand.u32 2147483647, %v1407_v41 }
 0x1c6   : > { %v1409_v44 = vpop.eup %1408 }
 0x1c7   : > { %1414 = vlog2.f32 %v1107_v43  ;;  %v1098_v46 = vadd.f32 1.0, %v1409_v44  ;;  %v1101_v18 = vmul.f32 -0.5, %v1409_v44  ;;  %v1111_v53 = vadd.f32 1.0, %v1110_v51 }
 0x1c8   : > { %v1411_v47 = vpop.eup %1410  ;;  %v1104_v45 = vand.u32 2147483647, %v1409_v44  ;;  %vm1697_vm5 = vcmp.lt.f32.partialorder %v1113_v55, 0.0004427343 }
 0x1c9   : > { %1416 = vlog2.f32 %v1098_v46  ;;  %v1125_v48 = vadd.f32 1.0, %v1411_v47  ;;  %v1128_v54 = vmul.f32 -0.5, %v1411_v47  ;;  %v1102_v38 = vadd.f32 1.0, %v1101_v18 }
 0x1ca   : > { %v1413_v49 = vpop.eup %1412  ;;  %v1112_v60 = vmul.f32 %v1407_v41, %v1111_v53  ;;  %v1131_v1 = vand.u32 2147483647, %v1411_v47  ;;  %vm1105_vm6 = vcmp.lt.f32.partialorder %v1104_v45, 0.0004427343 }
 0x1cb   : > { %1418 = vlog2.f32 %v1125_v48  ;;  %v1116_v50 = vadd.f32 1.0, %v1413_v49  ;;  %v1119_v58 = vmul.f32 -0.5, %v1413_v49  ;;  %v1129_v62 = vadd.f32 1.0, %v1128_v54 }
 0x1cc   : > { %v1103_v0 = vmul.f32 %v1409_v44, %v1102_v38  ;;  %v1122_v10 = vand.u32 2147483647, %v1413_v49  ;;  %vm1132_vm7 = vcmp.lt.f32.partialorder %v1131_v1, 0.0004427343 }
 0x1cd   : > { %1420 = vlog2.f32 %v1116_v50  ;;  %v1120_v6 = vadd.f32 1.0, %v1119_v58  ;;  %v1130_v61 = vmul.f32 %v1411_v47, %v1129_v62 }
 0x1ce   : > { %vm1123_vm8 = vcmp.lt.f32.partialorder %v1122_v10, 0.0004427343 }
 0x1cf   : > { %v1121_v22 = vmul.f32 %v1413_v49, %v1120_v6 }
 0x1d4   : > { %v1415_v56 = vpop.eup %1414 }
 0x1d5   : > { %v1109_v57 = vmul.f32 0.6931472, %v1415_v56 }
 0x1d6   : > { %v1417_v59 = vpop.eup %1416 }
 0x1d7   : > { %v1100_v52 = vmul.f32 0.6931472, %v1417_v59  ;;  %v1115_v3 = vsel %vm1697_vm5, %v1112_v60, %v1109_v57 }
 0x1d8   : > { %v1419_v2 = vpop.eup %1418  ;;  %v1135_v14 = vadd.f32 %v1115_v3, %v1079_v7 }
 0x1d9   : > { %v1106_v8 = vsel %vm1105_vm6, %v1103_v0, %v1100_v52  ;;  %v1127_v9 = vmul.f32 0.6931472, %v1419_v2 }
 0x1da   : > { %v1134_v12 = vadd.f32 %v1106_v8, %v1078_v4  ;;  %v1421_v13 = vpop.eup %1420  ;;  %v1163_v26 = vmul.f32 %v1150_v15, %v1135_v14 }
 0x1db   : > { %v1133_v17 = vsel %vm1132_vm7, %v1130_v61, %v1127_v9  ;;  %v1118_v21 = vmul.f32 0.6931472, %v1421_v13 }
 0x1dc   : > { %v1162_v23 = vmul.f32 %v1145_v11, %v1134_v12  ;;  %v1137_v27 = vadd.f32 %v1133_v17, %v1081_v25 }
 0x1dd   : > { %v1124_v16 = vsel %vm1123_vm8, %v1121_v22, %v1118_v21 }
 0x1de   : > { %v1136_v30 = vadd.f32 %v1124_v16, %v1080_v24  ;;  %v1166_v32 = vadd.f32 %v1163_v26, %v1162_v23  ;;  %v1165_v35 = vmul.f32 %v1160_v34, %v1137_v27 }
 0x1e0   : > { %v1164_v33 = vmul.f32 %v1155_v31, %v1136_v30 }
 0x1e2   : > { %v1167_v37 = vadd.f32 %v1166_v32, %v1164_v33 }
 0x1e4   : > { %v1168_v39 = vadd.f32 %v1167_v37, %v1165_v35 }
 0x1e6   : > { %v1169_v40 = vrot.slane %v1168_v39, 4 }
 0x1e8   : > { %v1170_v42 = vadd.f32 %v1169_v40, %v1168_v39 }
 0x1ea   : > { %v1171_v19 = vrot.slane %v1170_v42, 2 }
 0x1ec   : > { %v1172_v20 = vadd.f32 %v1171_v19, %v1170_v42 }
 0x1ee   : > { %v1173_v41 = vrot.slane %v1172_v20, 1 }
 0x1f0   : > { %v1174_v43 = vadd.f32 %v1173_v41, %v1172_v20 }
 0x1f2   : > { %v1185_v44 = vadd.f32 %v1184_v36, %v1174_v43 }
 0x1f4   : > { %1186 = vst [vmem:[%s273_s6] sm:$0x1] %v1185_v44 }
 0x1f5 PF: > { %s19_s26 = sadd.s32 1, %s1428_s26  }
 0x1f6   : > { %p16_p4 = scmp.ge.s32.totalorder %s19_s26, 4  }
 0x1f8   :  { %18 = sbr.rel (!%p16_p4) target bundleno = 3 (0x3), region = 78 }

</bundles_post_ra>
